<compile_context>
chip_gen: v5e
topology: v5e:2x2
jax: 0.10.0
libtpu: 0.0.40
codegen_flags: <defaults>
</compile_context>

<pallas_src>
import functools

import jax
import jax.numpy as jnp
from jax.experimental import pallas as pl
from jax.experimental.pallas import tpu as pltpu


def _round_up(x, m):
    return (x + m - 1) // m * m


# ----------------------------------------------------------------------------
# Fused kernel: stage1 conv(3x3, s2) + ReLU -> stage7 conv(1x1) + ReLU
#               -> global mean pool -> fc1 (C7 -> 1).  One grid step = one image.
# ----------------------------------------------------------------------------
def _disc_fused_kernel(planes_ref, w1_ref, b1_ref, w7_ref, b7_ref,
                       fcw_ref, fcb_ref, mask_ref, o_ref, *, taps, m_rows):
    # stage1: 3x3 stride-2 conv as 9 accumulating matmuls over statically
    # shifted windows of the stride-2 parity planes (in-kernel im2col).
    acc = None
    for t, plane_idx, row_off in taps:
        lhs = planes_ref[0, plane_idx, row_off:row_off + m_rows, :]
        part = jnp.dot(lhs.astype(jnp.bfloat16), w1_ref[t],
                       preferred_element_type=jnp.float32)
        acc = part if acc is None else acc + part
    h = jnp.maximum(acc + b1_ref[...], 0.0)                      # (M, C1) f32

    # stage7[0]: 1x1 conv + ReLU (bf16 operands, f32 accumulate / epilogue).
    z = jnp.dot(h.astype(jnp.bfloat16), w7_ref[...],
                preferred_element_type=jnp.float32) + b7_ref[...]
    z = jnp.maximum(z, 0.0)                                      # (M, C7) f32

    # global average pool + fc1 on the VPU/XLU (no MXU for a 1-wide dot).
    # mask holds 1/(OH*OW) on valid spatial rows and 0 on padding rows.
    pooled = jnp.sum(z * mask_ref[...], axis=0, keepdims=True)   # (1, C7) mean
    res = jnp.sum(pooled * fcw_ref[...], axis=1, keepdims=True) + fcb_ref[...]
    o_ref[...] = res.reshape(1, 1, 1)


# ----------------------------------------------------------------------------
# Host-side layout prep (pure reshuffles, same total bytes as padded input).
# ----------------------------------------------------------------------------
def _make_parity_planes(x_nchw, rows_pad):
    """NCHW -> zero-padded NHWC -> four stride-2 parity planes, flattened.

    Returns (B, 4, rows_pad, Cin).  Plane index = 2*row_parity + col_parity;
    each plane is the (OH+1, OW+1) stride-2 sub-grid flattened row-major and
    zero-padded to rows_pad rows.  No im2col expansion.
    """
    x = jnp.transpose(x_nchw, (0, 2, 3, 1))                      # NHWC
    x = jnp.pad(x, ((0, 0), (1, 1), (1, 1), (0, 0)))
    B, Hp, Wp, C = x.shape
    planes = []
    for p in range(2):
        for q in range(2):
            pq = x[:, p::2, q::2, :]                             # (B, OH+1, OW+1, C)
            planes.append(pq.reshape(B, -1, C))
    planes = jnp.stack(planes, axis=1)                           # (B, 4, L, C)
    L = planes.shape[2]
    planes = jnp.pad(planes, ((0, 0), (0, 0), (0, rows_pad - L), (0, 0)))
    return planes.astype(jnp.float32)


def init_params(key, cin=3, c_stage1=16, c_stage7=32):
    ks = jax.random.split(key, 6)
    scale = 0.1
    return {
        # synthetic frozen FENet stand-in
        "s1_w": scale * jax.random.normal(ks[0], (c_stage1, cin, 3, 3), jnp.float32),
        "s1_b": scale * jax.random.normal(ks[1], (c_stage1,), jnp.float32),
        "s7_w": scale * jax.random.normal(ks[2], (c_stage7, c_stage1, 1, 1), jnp.float32),
        "s7_b": scale * jax.random.normal(ks[3], (c_stage7,), jnp.float32),
        # Disc.fc1 : Linear(in=c_stage7, out=1)
        "fc1_w": scale * jax.random.normal(ks[4], (1, c_stage7), jnp.float32),
        "fc1_b": scale * jax.random.normal(ks[5], (1,), jnp.float32),
    }


def disc_forward(x_nchw, params):
    B, Cin, H, W = x_nchw.shape
    assert H % 2 == 0 and W % 2 == 0, "stand-in FENet stage1 assumes even H, W"
    OH, OW = H // 2, W // 2
    SPC = OW + 1                        # columns per parity plane
    M = _round_up(OH * SPC, 8)          # matmul row-tile (covers all valid rows)
    max_off = SPC + 1                   # largest tap row offset
    ROWS = _round_up(M + max_off, 8)    # padded flat-plane length

    C1 = params["s1_w"].shape[0]
    C7 = params["s7_w"].shape[0]

    planes = _make_parity_planes(x_nchw, ROWS)                   # (B, 4, ROWS, Cin)

    # per-tap weight matrices (bf16 for the MXU), f32 biases / fc weights
    w1 = jnp.stack([params["s1_w"][:, :, di, dj].T
                    for di in range(3) for dj in range(3)],
                   axis=0).astype(jnp.bfloat16)                  # (9, Cin, C1)
    b1 = params["s1_b"].reshape(1, C1).astype(jnp.float32)
    w7 = params["s7_w"][:, :, 0, 0].T.astype(jnp.bfloat16)       # (C1, C7)
    b7 = params["s7_b"].reshape(1, C7).astype(jnp.float32)
    fcw = params["fc1_w"].reshape(1, C7).astype(jnp.float32)
    fcb = params["fc1_b"].reshape(1, 1).astype(jnp.float32)

    # validity mask with the 1/(OH*OW) mean scale folded in
    r = jnp.arange(M)
    valid = ((r % SPC) < OW) & (r < OH * SPC)
    mask = jnp.where(valid, 1.0 / (OH * OW), 0.0).reshape(M, 1).astype(jnp.float32)

    # tap -> (parity plane, row offset) map for the 3x3 stride-2 conv
    taps = tuple((di * 3 + dj, (di % 2) * 2 + (dj % 2),
                  (di // 2) * SPC + (dj // 2))
                 for di in range(3) for dj in range(3))

    out = pl.pallas_call(
        functools.partial(_disc_fused_kernel, taps=taps, m_rows=M),
        out_shape=jax.ShapeDtypeStruct((B, 1, 1), jnp.float32),
        grid=(B,),
        in_specs=[
            pl.BlockSpec((1, 4, ROWS, Cin), lambda b: (b, 0, 0, 0)),
            pl.BlockSpec((9, Cin, C1), lambda b: (0, 0, 0)),
            pl.BlockSpec((1, C1), lambda b: (0, 0)),
            pl.BlockSpec((C1, C7), lambda b: (0, 0)),
            pl.BlockSpec((1, C7), lambda b: (0, 0)),
            pl.BlockSpec((1, C7), lambda b: (0, 0)),
            pl.BlockSpec((1, 1), lambda b: (0, 0)),
            pl.BlockSpec((M, 1), lambda b: (0, 0)),
        ],
        out_specs=pl.BlockSpec((1, 1, 1), lambda b: (b, 0, 0)),
        compiler_params=pltpu.CompilerParams(
            dimension_semantics=("parallel",)),
        # TODO(synk): for real (large) images add a spatial grid axis so each
        # grid step handles a row-tile of the image instead of the whole image.
    )(planes, w1, b1, w7, b7, fcw, fcb, mask)
    return out.reshape(B, 1)


# ----------------------------------------------------------------------------
# Pure-JAX reference (f32) for a numerical sanity check.
# ----------------------------------------------------------------------------
def disc_reference(x_nchw, params):
    x = jnp.transpose(x_nchw, (0, 2, 3, 1))
    w = jnp.transpose(params["s1_w"], (2, 3, 1, 0))              # HWIO
    y = jax.lax.conv_general_dilated(
        x, w, window_strides=(2, 2), padding=((1, 1), (1, 1)),
        dimension_numbers=("NHWC", "HWIO", "NHWC")) + params["s1_b"]
    y = jnp.maximum(y, 0.0)
    z = jnp.einsum("bhwc,dc->bhwd", y, params["s7_w"][:, :, 0, 0]) + params["s7_b"]
    z = jnp.maximum(z, 0.0)
    pooled = jnp.mean(z, axis=(1, 2))
    return pooled @ params["fc1_w"].T + params["fc1_b"]


if __name__ == "__main__":
    B, C_IN, H, W = 2, 3, 16, 16
    x = jax.random.normal(jax.random.PRNGKey(0), (B, C_IN, H, W), jnp.float32)
    params = init_params(jax.random.PRNGKey(42), cin=C_IN,
                         c_stage1=16, c_stage7=32)

    fwd = jax.jit(disc_forward)
    out = jax.block_until_ready(fwd(x, params))
    assert out.shape == (B, 1), out.shape

    ref = disc_reference(x, params)
    assert jnp.allclose(out, ref, atol=2e-2, rtol=2e-2), (out, ref)
    print("KERNEL_OK")
</pallas_src>

<mosaic_0001>
module attributes {stable_mosaic.version = 11 : i64} {
  func.func @_disc_fused_kernel(%arg0: i32, %arg1: memref<1x4x88x3xf32, #tpu.memory_space<vmem>>, %arg2: memref<9x3x16xbf16, #tpu.memory_space<vmem>>, %arg3: memref<1x16xf32, #tpu.memory_space<vmem>>, %arg4: memref<16x32xbf16, #tpu.memory_space<vmem>>, %arg5: memref<1x32xf32, #tpu.memory_space<vmem>>, %arg6: memref<1x32xf32, #tpu.memory_space<vmem>>, %arg7: memref<1x1xf32, #tpu.memory_space<vmem>>, %arg8: memref<72x1xf32, #tpu.memory_space<vmem>>, %arg9: memref<1x1x1xf32, #tpu.memory_space<vmem>>) attributes {dimension_semantics = [#tpu.dimension_semantics<parallel>], iteration_bounds = array<i64: 2>, scalar_prefetch = 0 : i64, scratch_operands = 0 : i64, tpu.core_type = #tpu.core_type<tc>, window_params = [{transform_indices = @transform_0, window_bounds = array<i64: 1, 4, 88, 3>}, {pipeline_mode = #tpu.pipeline_mode<synchronous>, transform_indices = @transform_1, window_bounds = array<i64: 9, 3, 16>}, {pipeline_mode = #tpu.pipeline_mode<synchronous>, transform_indices = @transform_2, window_bounds = array<i64: 1, 16>}, {pipeline_mode = #tpu.pipeline_mode<synchronous>, transform_indices = @transform_3, window_bounds = array<i64: 16, 32>}, {pipeline_mode = #tpu.pipeline_mode<synchronous>, transform_indices = @transform_4, window_bounds = array<i64: 1, 32>}, {pipeline_mode = #tpu.pipeline_mode<synchronous>, transform_indices = @transform_5, window_bounds = array<i64: 1, 32>}, {pipeline_mode = #tpu.pipeline_mode<synchronous>, transform_indices = @transform_6, window_bounds = array<i64: 1, 1>}, {pipeline_mode = #tpu.pipeline_mode<synchronous>, transform_indices = @transform_7, window_bounds = array<i64: 72, 1>}, {transform_indices = @transform_8, window_bounds = array<i64: 1, 1, 1>}]} {
    %c0 = arith.constant 0 : index
    %c0_0 = arith.constant 0 : index
    %c0_1 = arith.constant 0 : index
    %c0_2 = arith.constant 0 : index
    %0 = vector.load %arg1[%c0, %c0_0, %c0_1, %c0_2] : memref<1x4x88x3xf32, #tpu.memory_space<vmem>>, vector<1x1x72x3xf32>
    %1 = vector.shape_cast %0 : vector<1x1x72x3xf32> to vector<72x3xf32>
    %2 = arith.truncf %1 : vector<72x3xf32> to vector<72x3xbf16>
    %c0_3 = arith.constant 0 : index
    %c0_4 = arith.constant 0 : index
    %c0_5 = arith.constant 0 : index
    %3 = vector.load %arg2[%c0_3, %c0_4, %c0_5] : memref<9x3x16xbf16, #tpu.memory_space<vmem>>, vector<1x3x16xbf16>
    %4 = vector.shape_cast %3 : vector<1x3x16xbf16> to vector<3x16xbf16>
    %cst = arith.constant dense<0.000000e+00> : vector<72x16xf32>
    %5 = tpu.matmul %2, %4, %cst {dimension_numbers = #tpu.dot_dimension_numbers<[1], [0], [0], [1], [0, 0, 1, 1], [], []>} : vector<72x3xbf16>, vector<3x16xbf16>, vector<72x16xf32> -> vector<72x16xf32>
    %c0_6 = arith.constant 0 : index
    %c1 = arith.constant 1 : index
    %c0_7 = arith.constant 0 : index
    %c0_8 = arith.constant 0 : index
    %6 = vector.load %arg1[%c0_6, %c1, %c0_7, %c0_8] : memref<1x4x88x3xf32, #tpu.memory_space<vmem>>, vector<1x1x72x3xf32>
    %7 = vector.shape_cast %6 : vector<1x1x72x3xf32> to vector<72x3xf32>
    %8 = arith.truncf %7 : vector<72x3xf32> to vector<72x3xbf16>
    %c1_9 = arith.constant 1 : index
    %c0_10 = arith.constant 0 : index
    %c0_11 = arith.constant 0 : index
    %9 = vector.load %arg2[%c1_9, %c0_10, %c0_11] : memref<9x3x16xbf16, #tpu.memory_space<vmem>>, vector<1x3x16xbf16>
    %10 = vector.shape_cast %9 : vector<1x3x16xbf16> to vector<3x16xbf16>
    %cst_12 = arith.constant dense<0.000000e+00> : vector<72x16xf32>
    %11 = tpu.matmul %8, %10, %cst_12 {dimension_numbers = #tpu.dot_dimension_numbers<[1], [0], [0], [1], [0, 0, 1, 1], [], []>} : vector<72x3xbf16>, vector<3x16xbf16>, vector<72x16xf32> -> vector<72x16xf32>
    %12 = arith.addf %5, %11 : vector<72x16xf32>
    %c0_13 = arith.constant 0 : index
    %c0_14 = arith.constant 0 : index
    %c1_15 = arith.constant 1 : index
    %c0_16 = arith.constant 0 : index
    %13 = vector.load %arg1[%c0_13, %c0_14, %c1_15, %c0_16] : memref<1x4x88x3xf32, #tpu.memory_space<vmem>>, vector<1x1x72x3xf32>
    %14 = vector.shape_cast %13 : vector<1x1x72x3xf32> to vector<72x3xf32>
    %15 = arith.truncf %14 : vector<72x3xf32> to vector<72x3xbf16>
    %c2 = arith.constant 2 : index
    %c0_17 = arith.constant 0 : index
    %c0_18 = arith.constant 0 : index
    %16 = vector.load %arg2[%c2, %c0_17, %c0_18] : memref<9x3x16xbf16, #tpu.memory_space<vmem>>, vector<1x3x16xbf16>
    %17 = vector.shape_cast %16 : vector<1x3x16xbf16> to vector<3x16xbf16>
    %cst_19 = arith.constant dense<0.000000e+00> : vector<72x16xf32>
    %18 = tpu.matmul %15, %17, %cst_19 {dimension_numbers = #tpu.dot_dimension_numbers<[1], [0], [0], [1], [0, 0, 1, 1], [], []>} : vector<72x3xbf16>, vector<3x16xbf16>, vector<72x16xf32> -> vector<72x16xf32>
    %19 = arith.addf %12, %18 : vector<72x16xf32>
    %c0_20 = arith.constant 0 : index
    %c2_21 = arith.constant 2 : index
    %c0_22 = arith.constant 0 : index
    %c0_23 = arith.constant 0 : index
    %20 = vector.load %arg1[%c0_20, %c2_21, %c0_22, %c0_23] : memref<1x4x88x3xf32, #tpu.memory_space<vmem>>, vector<1x1x72x3xf32>
    %21 = vector.shape_cast %20 : vector<1x1x72x3xf32> to vector<72x3xf32>
    %22 = arith.truncf %21 : vector<72x3xf32> to vector<72x3xbf16>
    %c3 = arith.constant 3 : index
    %c0_24 = arith.constant 0 : index
    %c0_25 = arith.constant 0 : index
    %23 = vector.load %arg2[%c3, %c0_24, %c0_25] : memref<9x3x16xbf16, #tpu.memory_space<vmem>>, vector<1x3x16xbf16>
    %24 = vector.shape_cast %23 : vector<1x3x16xbf16> to vector<3x16xbf16>
    %cst_26 = arith.constant dense<0.000000e+00> : vector<72x16xf32>
    %25 = tpu.matmul %22, %24, %cst_26 {dimension_numbers = #tpu.dot_dimension_numbers<[1], [0], [0], [1], [0, 0, 1, 1], [], []>} : vector<72x3xbf16>, vector<3x16xbf16>, vector<72x16xf32> -> vector<72x16xf32>
    %26 = arith.addf %19, %25 : vector<72x16xf32>
    %c0_27 = arith.constant 0 : index
    %c3_28 = arith.constant 3 : index
    %c0_29 = arith.constant 0 : index
    %c0_30 = arith.constant 0 : index
    %27 = vector.load %arg1[%c0_27, %c3_28, %c0_29, %c0_30] : memref<1x4x88x3xf32, #tpu.memory_space<vmem>>, vector<1x1x72x3xf32>
    %28 = vector.shape_cast %27 : vector<1x1x72x3xf32> to vector<72x3xf32>
    %29 = arith.truncf %28 : vector<72x3xf32> to vector<72x3xbf16>
    %c4 = arith.constant 4 : index
    %c0_31 = arith.constant 0 : index
    %c0_32 = arith.constant 0 : index
    %30 = vector.load %arg2[%c4, %c0_31, %c0_32] : memref<9x3x16xbf16, #tpu.memory_space<vmem>>, vector<1x3x16xbf16>
    %31 = vector.shape_cast %30 : vector<1x3x16xbf16> to vector<3x16xbf16>
    %cst_33 = arith.constant dense<0.000000e+00> : vector<72x16xf32>
    %32 = tpu.matmul %29, %31, %cst_33 {dimension_numbers = #tpu.dot_dimension_numbers<[1], [0], [0], [1], [0, 0, 1, 1], [], []>} : vector<72x3xbf16>, vector<3x16xbf16>, vector<72x16xf32> -> vector<72x16xf32>
    %33 = arith.addf %26, %32 : vector<72x16xf32>
    %c0_34 = arith.constant 0 : index
    %c2_35 = arith.constant 2 : index
    %c1_36 = arith.constant 1 : index
    %c0_37 = arith.constant 0 : index
    %34 = vector.load %arg1[%c0_34, %c2_35, %c1_36, %c0_37] : memref<1x4x88x3xf32, #tpu.memory_space<vmem>>, vector<1x1x72x3xf32>
    %35 = vector.shape_cast %34 : vector<1x1x72x3xf32> to vector<72x3xf32>
    %36 = arith.truncf %35 : vector<72x3xf32> to vector<72x3xbf16>
    %c5 = arith.constant 5 : index
    %c0_38 = arith.constant 0 : index
    %c0_39 = arith.constant 0 : index
    %37 = vector.load %arg2[%c5, %c0_38, %c0_39] : memref<9x3x16xbf16, #tpu.memory_space<vmem>>, vector<1x3x16xbf16>
    %38 = vector.shape_cast %37 : vector<1x3x16xbf16> to vector<3x16xbf16>
    %cst_40 = arith.constant dense<0.000000e+00> : vector<72x16xf32>
    %39 = tpu.matmul %36, %38, %cst_40 {dimension_numbers = #tpu.dot_dimension_numbers<[1], [0], [0], [1], [0, 0, 1, 1], [], []>} : vector<72x3xbf16>, vector<3x16xbf16>, vector<72x16xf32> -> vector<72x16xf32>
    %40 = arith.addf %33, %39 : vector<72x16xf32>
    %c0_41 = arith.constant 0 : index
    %c0_42 = arith.constant 0 : index
    %c9 = arith.constant 9 : index
    %c0_43 = arith.constant 0 : index
    %41 = vector.load %arg1[%c0_41, %c0_42, %c9, %c0_43] : memref<1x4x88x3xf32, #tpu.memory_space<vmem>>, vector<1x1x72x3xf32>
    %42 = vector.shape_cast %41 : vector<1x1x72x3xf32> to vector<72x3xf32>
    %43 = arith.truncf %42 : vector<72x3xf32> to vector<72x3xbf16>
    %c6 = arith.constant 6 : index
    %c0_44 = arith.constant 0 : index
    %c0_45 = arith.constant 0 : index
    %44 = vector.load %arg2[%c6, %c0_44, %c0_45] : memref<9x3x16xbf16, #tpu.memory_space<vmem>>, vector<1x3x16xbf16>
    %45 = vector.shape_cast %44 : vector<1x3x16xbf16> to vector<3x16xbf16>
    %cst_46 = arith.constant dense<0.000000e+00> : vector<72x16xf32>
    %46 = tpu.matmul %43, %45, %cst_46 {dimension_numbers = #tpu.dot_dimension_numbers<[1], [0], [0], [1], [0, 0, 1, 1], [], []>} : vector<72x3xbf16>, vector<3x16xbf16>, vector<72x16xf32> -> vector<72x16xf32>
    %47 = arith.addf %40, %46 : vector<72x16xf32>
    %c0_47 = arith.constant 0 : index
    %c1_48 = arith.constant 1 : index
    %c9_49 = arith.constant 9 : index
    %c0_50 = arith.constant 0 : index
    %48 = vector.load %arg1[%c0_47, %c1_48, %c9_49, %c0_50] : memref<1x4x88x3xf32, #tpu.memory_space<vmem>>, vector<1x1x72x3xf32>
    %49 = vector.shape_cast %48 : vector<1x1x72x3xf32> to vector<72x3xf32>
    %50 = arith.truncf %49 : vector<72x3xf32> to vector<72x3xbf16>
    %c7 = arith.constant 7 : index
    %c0_51 = arith.constant 0 : index
    %c0_52 = arith.constant 0 : index
    %51 = vector.load %arg2[%c7, %c0_51, %c0_52] : memref<9x3x16xbf16, #tpu.memory_space<vmem>>, vector<1x3x16xbf16>
    %52 = vector.shape_cast %51 : vector<1x3x16xbf16> to vector<3x16xbf16>
    %cst_53 = arith.constant dense<0.000000e+00> : vector<72x16xf32>
    %53 = tpu.matmul %50, %52, %cst_53 {dimension_numbers = #tpu.dot_dimension_numbers<[1], [0], [0], [1], [0, 0, 1, 1], [], []>} : vector<72x3xbf16>, vector<3x16xbf16>, vector<72x16xf32> -> vector<72x16xf32>
    %54 = arith.addf %47, %53 : vector<72x16xf32>
    %c0_54 = arith.constant 0 : index
    %c0_55 = arith.constant 0 : index
    %c10 = arith.constant 10 : index
    %c0_56 = arith.constant 0 : index
    %55 = vector.load %arg1[%c0_54, %c0_55, %c10, %c0_56] : memref<1x4x88x3xf32, #tpu.memory_space<vmem>>, vector<1x1x72x3xf32>
    %56 = vector.shape_cast %55 : vector<1x1x72x3xf32> to vector<72x3xf32>
    %57 = arith.truncf %56 : vector<72x3xf32> to vector<72x3xbf16>
    %c8 = arith.constant 8 : index
    %c0_57 = arith.constant 0 : index
    %c0_58 = arith.constant 0 : index
    %58 = vector.load %arg2[%c8, %c0_57, %c0_58] : memref<9x3x16xbf16, #tpu.memory_space<vmem>>, vector<1x3x16xbf16>
    %59 = vector.shape_cast %58 : vector<1x3x16xbf16> to vector<3x16xbf16>
    %cst_59 = arith.constant dense<0.000000e+00> : vector<72x16xf32>
    %60 = tpu.matmul %57, %59, %cst_59 {dimension_numbers = #tpu.dot_dimension_numbers<[1], [0], [0], [1], [0, 0, 1, 1], [], []>} : vector<72x3xbf16>, vector<3x16xbf16>, vector<72x16xf32> -> vector<72x16xf32>
    %61 = arith.addf %54, %60 : vector<72x16xf32>
    %c0_60 = arith.constant 0 : index
    %c0_61 = arith.constant 0 : index
    %62 = vector.load %arg3[%c0_60, %c0_61] : memref<1x16xf32, #tpu.memory_space<vmem>>, vector<1x16xf32>
    %63 = vector.broadcast %62 : vector<1x16xf32> to vector<72x16xf32>
    %64 = arith.addf %61, %63 : vector<72x16xf32>
    %cst_62 = arith.constant 0.000000e+00 : f32
    %65 = vector.broadcast %cst_62 : f32 to vector<72x16xf32>
    %66 = arith.maximumf %64, %65 : vector<72x16xf32>
    %67 = arith.truncf %66 : vector<72x16xf32> to vector<72x16xbf16>
    %c0_63 = arith.constant 0 : index
    %c0_64 = arith.constant 0 : index
    %68 = vector.load %arg4[%c0_63, %c0_64] : memref<16x32xbf16, #tpu.memory_space<vmem>>, vector<16x32xbf16>
    %cst_65 = arith.constant dense<0.000000e+00> : vector<72x32xf32>
    %69 = tpu.matmul %67, %68, %cst_65 {dimension_numbers = #tpu.dot_dimension_numbers<[1], [0], [0], [1], [0, 0, 1, 1], [], []>} : vector<72x16xbf16>, vector<16x32xbf16>, vector<72x32xf32> -> vector<72x32xf32>
    %c0_66 = arith.constant 0 : index
    %c0_67 = arith.constant 0 : index
    %70 = vector.load %arg5[%c0_66, %c0_67] : memref<1x32xf32, #tpu.memory_space<vmem>>, vector<1x32xf32>
    %71 = vector.broadcast %70 : vector<1x32xf32> to vector<72x32xf32>
    %72 = arith.addf %69, %71 : vector<72x32xf32>
    %cst_68 = arith.constant 0.000000e+00 : f32
    %73 = vector.broadcast %cst_68 : f32 to vector<72x32xf32>
    %74 = arith.maximumf %72, %73 : vector<72x32xf32>
    %c0_69 = arith.constant 0 : index
    %c0_70 = arith.constant 0 : index
    %75 = vector.load %arg8[%c0_69, %c0_70] : memref<72x1xf32, #tpu.memory_space<vmem>>, vector<72x1xf32>
    %76 = vector.broadcast %75 : vector<72x1xf32> to vector<72x32xf32>
    %77 = arith.mulf %74, %76 : vector<72x32xf32>
    %cst_71 = arith.constant dense<0.000000e+00> : vector<32xf32>
    %78 = vector.multi_reduction <add>, %77, %cst_71 [0] : vector<72x32xf32> to vector<32xf32>
    %79 = vector.shape_cast %78 : vector<32xf32> to vector<1x32xf32>
    %c0_72 = arith.constant 0 : index
    %c0_73 = arith.constant 0 : index
    %80 = vector.load %arg6[%c0_72, %c0_73] : memref<1x32xf32, #tpu.memory_space<vmem>>, vector<1x32xf32>
    %81 = arith.mulf %79, %80 : vector<1x32xf32>
    %cst_74 = arith.constant dense<0.000000e+00> : vector<1xf32>
    %82 = vector.multi_reduction <add>, %81, %cst_74 [1] : vector<1x32xf32> to vector<1xf32>
    %83 = vector.shape_cast %82 : vector<1xf32> to vector<1x1xf32>
    %c0_75 = arith.constant 0 : index
    %c0_76 = arith.constant 0 : index
    %84 = vector.load %arg7[%c0_75, %c0_76] : memref<1x1xf32, #tpu.memory_space<vmem>>, vector<1x1xf32>
    %85 = arith.addf %83, %84 : vector<1x1xf32>
    %86 = vector.shape_cast %85 : vector<1x1xf32> to vector<1x1x1xf32>
    %c0_77 = arith.constant 0 : index
    %c0_78 = arith.constant 0 : index
    %c0_79 = arith.constant 0 : index
    %87 = vector.load %arg9[%c0_77, %c0_78, %c0_79] : memref<1x1x1xf32, #tpu.memory_space<vmem>>, vector<1x1x1xf32>
    tpu.vector_store %arg9[%c0_77, %c0_78, %c0_79], %86 {strides = array<i32>} : memref<1x1x1xf32, #tpu.memory_space<vmem>>, vector<1x1x1xf32>,
    return
  }
  func.func @transform_0(%arg0: i32) -> (i32, i32, i32, i32) {
    %c0_i32 = arith.constant 0 : i32
    %c0_i32_0 = arith.constant 0 : i32
    %c0_i32_1 = arith.constant 0 : i32
    %c0_i32_2 = arith.constant 0 : i32
    return %arg0, %c0_i32, %c0_i32_0, %c0_i32_1 : i32, i32, i32, i32
  }
  func.func @transform_1(%arg0: i32) -> (i32, i32, i32) {
    %c0_i32 = arith.constant 0 : i32
    %c0_i32_0 = arith.constant 0 : i32
    %c0_i32_1 = arith.constant 0 : i32
    %c0_i32_2 = arith.constant 0 : i32
    return %c0_i32, %c0_i32_0, %c0_i32_1 : i32, i32, i32
  }
  func.func @transform_2(%arg0: i32) -> (i32, i32) {
    %c0_i32 = arith.constant 0 : i32
    %c0_i32_0 = arith.constant 0 : i32
    %c0_i32_1 = arith.constant 0 : i32
    return %c0_i32, %c0_i32_0 : i32, i32
  }
  func.func @transform_3(%arg0: i32) -> (i32, i32) {
    %c0_i32 = arith.constant 0 : i32
    %c0_i32_0 = arith.constant 0 : i32
    %c0_i32_1 = arith.constant 0 : i32
    return %c0_i32, %c0_i32_0 : i32, i32
  }
  func.func @transform_4(%arg0: i32) -> (i32, i32) {
    %c0_i32 = arith.constant 0 : i32
    %c0_i32_0 = arith.constant 0 : i32
    %c0_i32_1 = arith.constant 0 : i32
    return %c0_i32, %c0_i32_0 : i32, i32
  }
  func.func @transform_5(%arg0: i32) -> (i32, i32) {
    %c0_i32 = arith.constant 0 : i32
    %c0_i32_0 = arith.constant 0 : i32
    %c0_i32_1 = arith.constant 0 : i32
    return %c0_i32, %c0_i32_0 : i32, i32
  }
  func.func @transform_6(%arg0: i32) -> (i32, i32) {
    %c0_i32 = arith.constant 0 : i32
    %c0_i32_0 = arith.constant 0 : i32
    %c0_i32_1 = arith.constant 0 : i32
    return %c0_i32, %c0_i32_0 : i32, i32
  }
  func.func @transform_7(%arg0: i32) -> (i32, i32) {
    %c0_i32 = arith.constant 0 : i32
    %c0_i32_0 = arith.constant 0 : i32
    %c0_i32_1 = arith.constant 0 : i32
    return %c0_i32, %c0_i32_0 : i32, i32
  }
  func.func @transform_8(%arg0: i32) -> (i32, i32, i32) {
    %c0_i32 = arith.constant 0 : i32
    %c0_i32_0 = arith.constant 0 : i32
    %c0_i32_1 = arith.constant 0 : i32
    return %arg0, %c0_i32, %c0_i32_0 : i32, i32, i32
  }
}

</mosaic_0001>

<bundles_post_ra>
// kernel: disc_forward.1
= control target key start
LH: loop header
LB: loop body
LE: loop exit
PB: predicated region body
PF: predicated region fallthrough
CT: control target
= control target key end

     0   :  { %s1411_s29 = smov 0   ;;  %s1712_s0 = inlined_call_operand.vmem [shape: f32[2,4,88,3], index: 0, kind: input, shape index: {}]   ;;  %s1713_s1 = inlined_call_operand.vmem [shape: bf16[9,3,16], index: 1, kind: input, shape index: {}]   ;;  %s1714_s2 = inlined_call_operand.vmem [shape: f32[1,16], index: 2, kind: input, shape index: {}]   ;;  %s1715_s3 = inlined_call_operand.vmem [shape: bf16[16,32], index: 3, kind: input, shape index: {}]   ;;  %s1716_s4 = inlined_call_operand.vmem [shape: f32[1,32], index: 4, kind: input, shape index: {}]   ;;  %s1717_s5 = inlined_call_operand.vmem [shape: f32[1,32], index: 5, kind: input, shape index: {}]   ;;  %s1718_s6 = inlined_call_operand.<no memory space> [shape: f32[1,1], index: 6, kind: input, shape index: {}]   ;;  %s1719_s7 = inlined_call_operand.vmem [shape: f32[72,1], index: 7, kind: input, shape index: {}]   ;;  %s1720_s8 = inlined_call_operand.vmem [shape: f32[2,1,1], index: 8, kind: output, shape index: {}]  }
   0x1   :  { %v13_v0 = vstv %s1718_s6 }
   0x2   :  { %14 = vst [vmem:[#allocation2] sm:$0x1] %v13_v0 }
   0x3 LB: > { %s1219_s30 = sadd.s32 4294967295, %s1359_s29   ;;  %p1223_p0 = scmp.ge.s32.totalorder %s1359_s29, 1  ;;  %s1359_s29 = sphi %s1411_s29, %s20_s29  }
   0x4   : > { %p264_p1 = scmp.lt.s32.totalorder %s1359_s29, 3 }
   0x6   : > { %p265_p2 = pnand %p1223_p0, %p264_p1 }
   0x7   : > { %p296_p3 = scmp.lt.s32.totalorder (!%p265_p2), %s1219_s30, 1 }
   0x8   : > { %268 = sbr.rel (%p265_p2) target bundleno = 624 (0x270), region = 52 }
   0xd   : > { %v1234_v1 = vld [vmem:[%s1713_s1 + $0x2] sm:$0x3]  ;;  %vm353_vm0 = vcmask 1040384   ;;  %vm354_vm1 = vcmask 1041408   ;;  %v1361_v2 = vmov 65535   ;;  %s1722_s30 = smov (!%p296_p3, %s1219_s30), 1 }
   0xe   : > { %v355_v3 = vsel %vm353_vm0, 4294967295, %v1361_v2  ;;  %v319_v4 = vld [vmem:[%s1713_s1] sm:$0x3]  ;;  %v1275_v5 = vld [vmem:[%s1713_s1 + $0x8] sm:$0x3]  ;;  %s1337_s18 = smul.u32 352, %s1722_s30  ;;  %s303_s16 = scalar_lea.vmem %s1720_s8, %s1722_s30 }
   0xf   : > { %v356_v6 = vsel %vm354_vm1, %v355_v3, 0  ;;  %v1245_v7 = vld [vmem:[%s1713_s1 + $0x4] sm:$0x3]  ;;  %v1260_v8 = vld [vmem:[%s1713_s1 + $0x6] sm:$0x3]  ;;  %vm337_vm2 = vcmask 23552  }
  0x10   : > { %v358_v9 = vand.u32 %v1234_v1, %v356_v6  ;;  %v409_v10 = vand.u32 %v356_v6, %v319_v4  ;;  %v630_v11 = vand.u32 %v1275_v5, %v356_v6  ;;  %v476_v12 = vand.u32 %v1245_v7, %v356_v6  ;;  %s1440_s21 = scalar_lea.vmem %s1712_s0, %s1337_s18  ;;  %v1296_v26 = vld [vmem:[%s1713_s1 + $0xc] sm:$0x3]  ;;  %v1311_v27 = vld [vmem:[%s1713_s1 + $0xe] sm:$0x3]  ;;  %v1290_v30 = vld [vmem:[%s1713_s1 + $0xa] sm:$0x3] }
  0x11   : > { %v553_v13 = vand.u32 %v1260_v8, %v356_v6  ;;  %v1225_v14 = vld [vmem:[%s1440_s21 + $0x58] sm:$0xff]  ;;  %v1226_v15 = vld [vmem:[%s1440_s21 + $0x60] sm:$0xff]  ;;  %v1231_v16 = vld [vmem:[%s1440_s21 + $0x88] sm:$0xff]  ;;  %v782_v28 = vand.u32 %v1296_v26, %v356_v6  ;;  %v858_v29 = vand.u32 %v1311_v27, %v356_v6  ;;  %v706_v31 = vand.u32 %v1290_v30, %v356_v6 }
  0x12   : > { %367 = vmatpush.bf16.msra.mxu0 %v358_v9  ;;  %1335 = vmatpush.bf16.msra.mxu2 %v358_v9  ;;  %v330_v17 = vpack.c.bf16 %v1226_v15, %v1225_v14  ;;  %v1232_v18 = vld [vmem:[%s1440_s21 + $0x90] sm:$0xff]  ;;  %v305_v19 = vld [vmem:[%s1440_s21] sm:$0xff]  ;;  %v306_v20 = vld [vmem:[%s1440_s21 + $0x8] sm:$0xff]  ;;  %vm1017_vm3 = vcmask 130048   ;;  %vm1138_vm4 = vcmask 261120   ;;  %vm1164_vm5 = vcmask 253952  }
  0x13   : > { %418 = vmatpush.bf16.msra.mxu1 %v409_v10  ;;  %1336 = vmatpush.bf16.msra.mxu3 %v409_v10  ;;  %v333_v21 = vpack.c.bf16 %v1232_v18, %v1231_v16  ;;  %v314_v22 = vpack.c.bf16 %v306_v20, %v305_v19  ;;  %v311_v23 = vld [vmem:[%s1440_s21 + $0x30] sm:$0xff]  ;;  %v312_v24 = vld [vmem:[%s1440_s21 + $0x38] sm:$0xff]  ;;  %v1227_v32 = vld [vmem:[%s1440_s21 + $0x68] sm:$0xff]  ;;  %vm1170_vm6 = vcmask 0  }
  0x14   : > { %v317_v25 = vpack.c.bf16 %v312_v24, %v311_v23  ;;  %v1228_v33 = vld [vmem:[%s1440_s21 + $0x70] sm:$0xff]  ;;  %v1233_v34 = vld [vmem:[%s1440_s21 + $0x98] sm:$0xff]  ;;  %v313_v37 = vld [vmem:[%s1440_s21 + $0x40] sm:$0xff] }
  0x15   : > { %1235 = vmatmul.msk.bf16.vlgmr.msra.gmra.mxu0 %vm337_vm2, %v330_v17  ;;  %1238 = vmatmul.msk.bf16.vlgmr.msra.gmra.mxu2 %vm337_vm2, %v333_v21  ;;  %v307_v35 = vld [vmem:[%s1440_s21 + $0x10] sm:$0xff]  ;;  %v308_v36 = vld [vmem:[%s1440_s21 + $0x18] sm:$0xff]  ;;  %v331_v38 = vpack.c.bf16 %v1228_v33, %v1227_v32  ;;  %v334_v39 = vpack.c.bf16 %v1233_v34, %v1233_v34  ;;  %v318_v41 = vpack.c.bf16 %v313_v37, %v313_v37  ;;  %v1230_v45 = vld [vmem:[%s1440_s21 + $0x80] sm:$0xff] }
  0x16   : > { %639 = vmatpush.bf16.msrb.mxu0 %v630_v11  ;;  %485 = vmatpush.bf16.msrb.mxu2 %v476_v12  ;;  %v315_v40 = vpack.c.bf16 %v308_v36, %v307_v35  ;;  %v1317_v42 = vld [vmem:[%s1713_s1 + $0x10] sm:$0x3]  ;;  %v1229_v44 = vld [vmem:[%s1440_s21 + $0x78] sm:$0xff]  ;;  %v309_v46 = vld [vmem:[%s1440_s21 + $0x20] sm:$0xff] }
  0x17   : > { %562 = vmatpush.bf16.msrb.mxu3 %v553_v13  ;;  %1240 = vmatmul.msk.bf16.vlgmr.msra.gmra.mxu1 %vm337_vm2, %v314_v22  ;;  %v934_v43 = vand.u32 %v1317_v42, %v356_v6  ;;  %v310_v47 = vld [vmem:[%s1440_s21 + $0x28] sm:$0xff]  ;;  %v1251_v50 = vld [vmem:[%s1440_s21 + $0xb0] sm:$0xff]  ;;  %v1252_v51 = vld [vmem:[%s1440_s21 + $0xb8] sm:$0xff]  ;;  %v332_v52 = vpack.c.bf16 %v1230_v45, %v1229_v44 }
  0x18   : > { %1243 = vmatmul.msk.bf16.vlgmr.msra.gmra.mxu3 %vm337_vm2, %v317_v25  ;;  %715 = vmatpush.bf16.msrb.mxu1 %v706_v31  ;;  %v444_v48 = vld [vmem:[%s1440_s21 + $0x1] sm:$0xff]  ;;  %v1482_v49 = vld [vmem:[%s1440_s21 + $0x9] sm:$0xff]  ;;  %v316_v53 = vpack.c.bf16 %v310_v47, %v309_v46  ;;  %v530_v55 = vpack.c.bf16 %v1252_v51, %v1251_v50  ;;  %v1492_v56 = vld [vmem:[%s1440_s21 + $0x11] sm:$0xff] }
  0x19   : > { %v453_v54 = vpack.c.bf16 %v1482_v49, %v444_v48  ;;  %v1266_v57 = vld [vmem:[%s1440_s21 + $0x108] sm:$0xff]  ;;  %v1267_v58 = vld [vmem:[%s1440_s21 + $0x110] sm:$0xff]  ;;  %v1497_v59 = vld [vmem:[%s1440_s21 + $0x19] sm:$0xff] }
  0x1a   : > { %791 = vmatpush.bf16.msra.mxu2 %v782_v28  ;;  %943 = vmatpush.bf16.msra.mxu0 %v934_v43  ;;  %v1281_v60 = vld [vmem:[%s1440_s21 + $0xb1] sm:$0xff]  ;;  %v1282_v61 = vld [vmem:[%s1440_s21 + $0xb9] sm:$0xff]  ;;  %v1254_v63 = vld [vmem:[%s1440_s21 + $0xc8] sm:$0xff]  ;;  %v607_v0 = vpack.c.bf16 %v1267_v58, %v1266_v57  ;;  %v454_v1 = vpack.c.bf16 %v1497_v59, %v1492_v56  ;;  %v759_v43 = vpack.c.bf16 %v1492_v56, %v1482_v49 }
  0x1b   : > { %867 = vmatpush.bf16.msra.mxu3 %v858_v29  ;;  %v1253_v62 = vld [vmem:[%s1440_s21 + $0xc0] sm:$0xff]  ;;  %v683_v2 = vpack.c.bf16 %v1282_v61, %v1281_v60  ;;  %v1268_v5 = vld [vmem:[%s1440_s21 + $0x118] sm:$0xff]  ;;  %v1515_v7 = vld [vmem:[%s1440_s21 + $0x29] sm:$0xff] }
  0x1c   : > { %v531_v3 = vpack.c.bf16 %v1254_v63, %v1253_v62  ;;  %v1510_v4 = vld [vmem:[%s1440_s21 + $0x21] sm:$0xff]  ;;  %v1284_v9 = vld [vmem:[%s1440_s21 + $0xc9] sm:$0xff]  ;;  %v1256_v11 = vld [vmem:[%s1440_s21 + $0xd8] sm:$0xff] }
  0x1d   : > { %v1269_v6 = vld [vmem:[%s1440_s21 + $0x120] sm:$0xff]  ;;  %v1255_v10 = vld [vmem:[%s1440_s21 + $0xd0] sm:$0xff]  ;;  %v455_v13 = vpack.c.bf16 %v1515_v7, %v1510_v4  ;;  %v1270_v17 = vld [vmem:[%s1440_s21 + $0x128] sm:$0xff]  ;;  %v760_v49 = vpack.c.bf16 %v1510_v4, %v1497_v59 }
  0x1e   : > { %v1283_v8 = vld [vmem:[%s1440_s21 + $0xc1] sm:$0xff]  ;;  %v608_v12 = vpack.c.bf16 %v1269_v6, %v1268_v5  ;;  %v532_v15 = vpack.c.bf16 %v1256_v11, %v1255_v10  ;;  %v1528_v16 = vld [vmem:[%s1440_s21 + $0x31] sm:$0xff]  ;;  %v1533_v19 = vld [vmem:[%s1440_s21 + $0x39] sm:$0xff] }
  0x1f   : > { %v684_v14 = vpack.c.bf16 %v1284_v9, %v1283_v8  ;;  %v1271_v18 = vld [vmem:[%s1440_s21 + $0x130] sm:$0xff]  ;;  %v1286_v21 = vld [vmem:[%s1440_s21 + $0xd9] sm:$0xff]  ;;  %v1258_v23 = vld [vmem:[%s1440_s21 + $0xe8] sm:$0xff]  ;;  %v456_v25 = vpack.c.bf16 %v1533_v19, %v1528_v16  ;;  %v761_v5 = vpack.c.bf16 %v1528_v16, %v1515_v7 }
  0x20   : > { %v1285_v20 = vld [vmem:[%s1440_s21 + $0xd1] sm:$0xff]  ;;  %v1257_v22 = vld [vmem:[%s1440_s21 + $0xe0] sm:$0xff]  ;;  %v609_v24 = vpack.c.bf16 %v1271_v18, %v1270_v17  ;;  %v1288_v32 = vld [vmem:[%s1440_s21 + $0xe9] sm:$0xff] }
  0x21   : > { %v685_v26 = vpack.c.bf16 %v1286_v21, %v1285_v20  ;;  %v533_v27 = vpack.c.bf16 %v1258_v23, %v1257_v22  ;;  %v1272_v28 = vld [vmem:[%s1440_s21 + $0x138] sm:$0xff]  ;;  %v1273_v29 = vld [vmem:[%s1440_s21 + $0x140] sm:$0xff]  ;;  %v1259_v33 = vld [vmem:[%s1440_s21 + $0xf0] sm:$0xff] }
  0x22   : > { %v1548_v30 = vld [vmem:[%s1440_s21 + $0x41] sm:$0xff]  ;;  %v610_v34 = vpack.c.bf16 %v1273_v29, %v1272_v28  ;;  %v534_v37 = vpack.c.bf16 %v1259_v33, %v1259_v33  ;;  %v902_v46 = vld [vmem:[%s1440_s21 + $0xa] sm:$0xff]  ;;  %v903_v47 = vld [vmem:[%s1440_s21 + $0x12] sm:$0xff] }
  0x23   : > { %v1287_v31 = vld [vmem:[%s1440_s21 + $0xe1] sm:$0xff]  ;;  %v457_v35 = vpack.c.bf16 %v1548_v30, %v1548_v30  ;;  %v1304_v48 = vld [vmem:[%s1440_s21 + $0x71] sm:$0xff]  ;;  %v1305_v50 = vld [vmem:[%s1440_s21 + $0x79] sm:$0xff]  ;;  %v911_v51 = vpack.c.bf16 %v903_v47, %v902_v46 }
  0x24   : > { %v686_v36 = vpack.c.bf16 %v1288_v32, %v1287_v31  ;;  %v904_v62 = vld [vmem:[%s1440_s21 + $0x1a] sm:$0xff]  ;;  %v905_v63 = vld [vmem:[%s1440_s21 + $0x22] sm:$0xff]  ;;  %v906_v16 = vld [vmem:[%s1440_s21 + $0x2a] sm:$0xff] }
  0x25   : > { %1236 = vmatmul.msk.bf16.gmra.mxu0 %vm337_vm2, %v331_v38  ;;  %1239 = vmatmul.msk.bf16.gmra.mxu2 %vm337_vm2, %v334_v39  ;;  %v1274_v38 = vld [vmem:[%s1440_s21 + $0x148] sm:$0xff]  ;;  %v1289_v39 = vld [vmem:[%s1440_s21 + $0xf1] sm:$0xff]  ;;  %v1309_v20 = vld [vmem:[%s1440_s21 + $0x99] sm:$0xff] }
  0x26   : > { %v611_v42 = vpack.c.bf16 %v1274_v38, %v1274_v38  ;;  %v687_v44 = vpack.c.bf16 %v1289_v39, %v1289_v39  ;;  %v907_v17 = vld [vmem:[%s1440_s21 + $0x32] sm:$0xff]  ;;  %v1334_v29 = vld [vmem:[%s1715_s3] sm:$0xff]  ;;  %v758_v38 = vld [vmem:[%s1440_s21 + $0x49] sm:$0xff] }
  0x27   : > { %1241 = vmatmul.msk.bf16.gmra.mxu1 %vm337_vm2, %v315_v40  ;;  %v1302_v40 = vld [vmem:[%s1440_s21 + $0x61] sm:$0xff]  ;;  %v1308_v18 = vld [vmem:[%s1440_s21 + $0x91] sm:$0xff]  ;;  %v913_v22 = vpack.c.bf16 %v907_v17, %v906_v16  ;;  %v763_v46 = vpack.c.bf16 %v758_v38, %v758_v38 }
  0x28   : > { %1244 = vmatmul.msk.bf16.gmra.mxu3 %vm337_vm2, %v318_v41  ;;  %v1303_v41 = vld [vmem:[%s1440_s21 + $0x69] sm:$0xff]  ;;  %1040 = vmatpush.bf16.msra.mxu1 %v1334_v29 }
  0x29   : > { %v835_v45 = vpack.c.bf16 %v1303_v41, %v1302_v40  ;;  %v1310_v40 = vld [vmem:[%s1440_s21 + $0xa1] sm:$0xff] }
  0x35   : > { %1237 = vmatmul.msk.bf16.gmra.mxu0 %vm337_vm2, %v332_v52  ;;  %1246 = vmatmul.msk.bf16.vlgmr.msrb.gmra.mxu2 %vm337_vm2, %v453_v54  ;;  %v836_v54 = vpack.c.bf16 %v1305_v50, %v1304_v48  ;;  %v839_v50 = vpack.c.bf16 %v1310_v40, %v1310_v40 }
  0x37   : > { %1242 = vmatmul.msk.bf16.gmra.mxu1 %vm337_vm2, %v316_v53 }
  0x38   : > { %1261 = vmatmul.msk.bf16.vlgmr.msrb.gmra.mxu3 %vm337_vm2, %v530_v55 }
  0x45   : > { %1276 = vmatmul.msk.bf16.vlgmr.msrb.gmra.mxu0 %vm337_vm2, %v607_v0  ;;  %1247 = vmatmul.msk.bf16.gmra.mxu2 %vm337_vm2, %v454_v1  ;;  %v1306_v0 = vld [vmem:[%s1440_s21 + $0x81] sm:$0xff]  ;;  %v1307_v1 = vld [vmem:[%s1440_s21 + $0x89] sm:$0xff] }
  0x46   : > { %v837_v9 = vpack.c.bf16 %v1307_v1, %v1306_v0 }
  0x47   : > { %1291 = vmatmul.msk.bf16.vlgmr.msrb.gmra.mxu1 %vm337_vm2, %v683_v2  ;;  %v912_v2 = vpack.c.bf16 %v905_v63, %v904_v62  ;;  %v910_v62 = vld [vmem:[%s1440_s21 + $0x4a] sm:$0xff] }
  0x48   : > { %1262 = vmatmul.msk.bf16.gmra.mxu3 %vm337_vm2, %v531_v3  ;;  %v915_v0 = vpack.c.bf16 %v910_v62, %v910_v62 }
  0x55   : > { %1277 = vmatmul.msk.bf16.gmra.mxu0 %vm337_vm2, %v608_v12  ;;  %1248 = vmatmul.msk.bf16.gmra.mxu2 %vm337_vm2, %v455_v13 }
  0x57   : > { %1292 = vmatmul.msk.bf16.gmra.mxu1 %vm337_vm2, %v684_v14 }
  0x58   : > { %1263 = vmatmul.msk.bf16.gmra.mxu3 %vm337_vm2, %v532_v15 }
  0x65   : > { %1278 = vmatmul.msk.bf16.gmra.mxu0 %vm337_vm2, %v609_v24  ;;  %1249 = vmatmul.msk.bf16.gmra.mxu2 %vm337_vm2, %v456_v25  ;;  %v762_v25 = vpack.c.bf16 %v1548_v30, %v1533_v19 }
  0x67   : > { %1293 = vmatmul.msk.bf16.gmra.mxu1 %vm337_vm2, %v685_v26 }
  0x68   : > { %1264 = vmatmul.msk.bf16.gmra.mxu3 %vm337_vm2, %v533_v27  ;;  %v838_v27 = vpack.c.bf16 %v1309_v20, %v1308_v18 }
  0x75   : > { %1279 = vmatmul.msk.bf16.gmra.mxu0 %vm337_vm2, %v610_v34  ;;  %1250 = vmatmul.msk.bf16.gmra.mxu2 %vm337_vm2, %v457_v35 }
  0x77   : > { %1294 = vmatmul.msk.bf16.gmra.mxu1 %vm337_vm2, %v686_v36  ;;  %v908_v36 = vld [vmem:[%s1440_s21 + $0x3a] sm:$0xff] }
  0x78   : > { %1265 = vmatmul.msk.bf16.gmra.mxu3 %vm337_vm2, %v534_v37  ;;  %v909_v37 = vld [vmem:[%s1440_s21 + $0x42] sm:$0xff] }
  0x85   : > { %1280 = vmatmul.msk.bf16.gmra.mxu0 %vm337_vm2, %v611_v42  ;;  %1297 = vmatmul.msk.bf16.vlgmr.msra.gmra.mxu2 %vm337_vm2, %v759_v43  ;;  %v914_v42 = vpack.c.bf16 %v909_v37, %v908_v36 }
  0x87   : > { %1295 = vmatmul.msk.bf16.gmra.mxu1 %vm337_vm2, %v687_v44 }
  0x88   : > { %1312 = vmatmul.msk.bf16.vlgmr.msra.gmra.mxu3 %vm337_vm2, %v835_v45 }
  0x92   : > { %v369_v52 = vpop.f32.mrf.mxu0 }
  0x94   : > { %v420_v53 = vpop.f32.mrf.mxu1 }
  0x95   : > { %v421_v55 = vadd.f32 %v420_v53, %v369_v52  ;;  %1318 = vmatmul.msk.bf16.vlgmr.msra.gmra.mxu0 %vm337_vm2, %v911_v51  ;;  %1298 = vmatmul.msk.bf16.gmra.mxu2 %vm337_vm2, %v760_v49 }
  0x98   : > { %1313 = vmatmul.msk.bf16.gmra.mxu3 %vm337_vm2, %v836_v54  ;;  %v384_v56 = vpop.f32.mrf.mxu2 }
  0x9a   : > { %v371_v58 = vpop.f32.mrf.mxu0 }
  0x9b   : > { %v435_v57 = vpop.f32.mrf.mxu3 }
  0x9c   : > { %v1578_v60 = vadd.f32 %v435_v57, %v384_v56  ;;  %v422_v61 = vpop.f32.mrf.mxu1 }
  0x9d   : > { %v423_v39 = vadd.f32 %v422_v61, %v371_v58 }
  0xa0   : > { %v386_v59 = vpop.f32.mrf.mxu2 }
  0xa2   : > { %v374_v4 = vpop.f32.mrf.mxu0 }
  0xa3   : > { %v437_v3 = vpop.f32.mrf.mxu3 }
  0xa4   : > { %v1586_v6 = vadd.f32 %v437_v3, %v386_v59  ;;  %v425_v8 = vpop.f32.mrf.mxu1 }
  0xa5   : > { %v426_v10 = vadd.f32 %v425_v8, %v374_v4  ;;  %1319 = vmatmul.msk.bf16.gmra.mxu0 %vm337_vm2, %v912_v2  ;;  %1299 = vmatmul.msk.bf16.gmra.mxu2 %vm337_vm2, %v761_v5 }
  0xa8   : > { %1314 = vmatmul.msk.bf16.gmra.mxu3 %vm337_vm2, %v837_v9  ;;  %v389_v11 = vpop.f32.mrf.mxu2 }
  0xaa   : > { %v376_v13 = vpop.f32.mrf.mxu0 }
  0xab   : > { %v440_v12 = vpop.f32.mrf.mxu3 }
  0xac   : > { %v1591_v14 = vadd.f32 %v440_v12, %v389_v11  ;;  %v427_v15 = vpop.f32.mrf.mxu1 }
  0xad   : > { %v428_v7 = vadd.f32 %v427_v15, %v376_v13 }
  0xb0   : > { %v391_v21 = vpop.f32.mrf.mxu2 }
  0xb2   : > { %v379_v24 = vpop.f32.mrf.mxu0 }
  0xb3   : > { %v442_v23 = vpop.f32.mrf.mxu3 }
  0xb4   : > { %v430_v26 = vpop.f32.mrf.mxu1 }
  0xb5   : > { %v431_v28 = vadd.f32 %v430_v26, %v379_v24  ;;  %1320 = vmatmul.msk.bf16.gmra.mxu0 %vm337_vm2, %v913_v22  ;;  %1300 = vmatmul.msk.bf16.gmra.mxu2 %vm337_vm2, %v762_v25 }
  0xb8   : > { %1315 = vmatmul.msk.bf16.gmra.mxu3 %vm337_vm2, %v838_v27  ;;  %v487_v31 = vpop.f32.mrf.mxu2 }
  0xb9   : > { %v511_v19 = vadd.f32 %v487_v31, %v421_v55 }
  0xba   : > { %v381_v32 = vpop.f32.mrf.mxu0 }
  0xbb   : > { %v564_v30 = vpop.f32.mrf.mxu3 }
  0xbc   : > { %v432_v33 = vpop.f32.mrf.mxu1  ;;  %v588_v34 = vadd.f32 %v564_v30, %v511_v19 }
  0xbd   : > { %v433_v35 = vadd.f32 %v432_v33, %v381_v32 }
  0xc0   : > { %v489_v41 = vpop.f32.mrf.mxu2 }
  0xc1   : > { %v512_v43 = vadd.f32 %v489_v41, %v423_v39 }
  0xc2   : > { %v641_v45 = vpop.f32.mrf.mxu0 }
  0xc3   : > { %v566_v44 = vpop.f32.mrf.mxu3  ;;  %v665_v47 = vadd.f32 %v641_v45, %v588_v34 }
  0xc4   : > { %v717_v48 = vpop.f32.mrf.mxu1  ;;  %v589_v51 = vadd.f32 %v566_v44, %v512_v43 }
  0xc5   : > { %v1609_v52 = vadd.f32 %v717_v48, %v665_v47  ;;  %1321 = vmatmul.msk.bf16.gmra.mxu0 %vm337_vm2, %v914_v42  ;;  %1301 = vmatmul.msk.bf16.gmra.mxu2 %vm337_vm2, %v763_v46 }
  0xc8   : > { %1316 = vmatmul.msk.bf16.gmra.mxu3 %vm337_vm2, %v839_v50  ;;  %v492_v49 = vpop.f32.mrf.mxu2 }
  0xc9   : > { %v513_v53 = vadd.f32 %v492_v49, %v426_v10 }
  0xca   : > { %v643_v55 = vpop.f32.mrf.mxu0 }
  0xcb   : > { %v569_v54 = vpop.f32.mrf.mxu3  ;;  %v666_v56 = vadd.f32 %v643_v55, %v589_v51 }
  0xcc   : > { %v719_v57 = vpop.f32.mrf.mxu1  ;;  %v590_v58 = vadd.f32 %v569_v54, %v513_v53 }
  0xcd   : > { %v1614_v61 = vadd.f32 %v719_v57, %v666_v56 }
  0xd0   : > { %v494_v63 = vpop.f32.mrf.mxu2 }
  0xd1   : > { %v514_v1 = vadd.f32 %v494_v63, %v428_v7 }
  0xd2   : > { %v646_v2 = vpop.f32.mrf.mxu0 }
  0xd3   : > { %v571_v59 = vpop.f32.mrf.mxu3  ;;  %v667_v3 = vadd.f32 %v646_v2, %v590_v58 }
  0xd4   : > { %v722_v4 = vpop.f32.mrf.mxu1  ;;  %v591_v5 = vadd.f32 %v571_v59, %v514_v1  ;;  %v1075_v1 = vld [vmem:[%s1719_s7] sm:$0xff] }
  0xd5   : > { %v1617_v8 = vadd.f32 %v722_v4, %v667_v3  ;;  %1322 = vmatmul.msk.bf16.gmra.mxu0 %vm337_vm2, %v915_v0  ;;  %v1362_v0 = vmov 0  }
  0xd6   : > { %1348 = vset.pattern.permute.xlu0 %v1362_v0  ;;  %1349 = vset.pattern.permute.xlu1 %v1362_v0 }
  0xd7   : > { %1086 = vperm.xlu0 %1348, %v1075_v1   ;;  %1350 = vset.pattern.permute.xlu2 %v1362_v0 }
  0xd8   : > { %v497_v9 = vpop.f32.mrf.mxu2 }
  0xd9   : > { %v515_v10 = vadd.f32 %v497_v9, %v431_v28 }
  0xda   : > { %v648_v12 = vpop.f32.mrf.mxu0 }
  0xdb   : > { %v574_v11 = vpop.f32.mrf.mxu3  ;;  %v668_v13 = vadd.f32 %v648_v12, %v591_v5 }
  0xdc   : > { %v724_v15 = vpop.f32.mrf.mxu1  ;;  %v592_v16 = vadd.f32 %v574_v11, %v515_v10 }
  0xdd   : > { %v1620_v17 = vadd.f32 %v724_v15, %v668_v13  ;;  %v1076_v13 = vld [vmem:[%s1719_s7 + $0x8] sm:$0xff] }
  0xdf   : > { %1091 = vperm.xlu0 %1348, %v1076_v13  }
  0xe0   : > { %v499_v18 = vpop.f32.mrf.mxu2 }
  0xe1   : > { %v516_v7 = vadd.f32 %v499_v18, %v433_v35 }
  0xe2   : > { %v651_v21 = vpop.f32.mrf.mxu0 }
  0xe3   : > { %v576_v20 = vpop.f32.mrf.mxu3  ;;  %v669_v22 = vadd.f32 %v651_v21, %v592_v16 }
  0xe4   : > { %v727_v23 = vpop.f32.mrf.mxu1  ;;  %v593_v24 = vadd.f32 %v576_v20, %v516_v7 }
  0xe5   : > { %v1622_v25 = vadd.f32 %v727_v23, %v669_v22  ;;  %v1077_v23 = vld [vmem:[%s1719_s7 + $0x10] sm:$0xff] }
  0xe6   : > { %1096 = vperm.xlu1 %1349, %v1077_v23  }
  0xe8   : > { %v502_v26 = vpop.f32.mrf.mxu2 }
  0xe9   : > { %v517_v27 = vadd.f32 %v502_v26, %v1578_v60 }
  0xea   : > { %v653_v29 = vpop.f32.mrf.mxu0 }
  0xeb   : > { %v579_v28 = vpop.f32.mrf.mxu3  ;;  %v670_v31 = vadd.f32 %v653_v29, %v593_v24 }
  0xec   : > { %v729_v19 = vpop.f32.mrf.mxu1  ;;  %v594_v30 = vadd.f32 %v579_v28, %v517_v27 }
  0xed   : > { %v1625_v32 = vadd.f32 %v729_v19, %v670_v31 }
  0xf0   : > { %v504_v33 = vpop.f32.mrf.mxu2 }
  0xf1   : > { %v518_v34 = vadd.f32 %v504_v33, %v1586_v6 }
  0xf2   : > { %v656_v36 = vpop.f32.mrf.mxu0 }
  0xf3   : > { %v581_v35 = vpop.f32.mrf.mxu3  ;;  %v671_v37 = vadd.f32 %v656_v36, %v594_v30 }
  0xf4   : > { %v732_v38 = vpop.f32.mrf.mxu1  ;;  %v595_v39 = vadd.f32 %v581_v35, %v518_v34 }
  0xf5   : > { %v1628_v40 = vadd.f32 %v732_v38, %v671_v37 }
  0xf8   : > { %v507_v41 = vpop.f32.mrf.mxu2 }
  0xf9   : > { %v519_v60 = vadd.f32 %v507_v41, %v1591_v14 }
  0xfa   : > { %v658_v43 = vpop.f32.mrf.mxu0 }
  0xfb   : > { %v584_v42 = vpop.f32.mrf.mxu3  ;;  %v672_v44 = vadd.f32 %v658_v43, %v595_v39 }
  0xfc   : > { %v734_v45 = vpop.f32.mrf.mxu1  ;;  %v596_v46 = vadd.f32 %v584_v42, %v519_v60 }
  0xfd   : > { %v1631_v47 = vadd.f32 %v734_v45, %v672_v44 }
 0x100   : > { %v509_v48 = vpop.f32.mrf.mxu2 }
 0x102   : > { %v661_v6 = vpop.f32.mrf.mxu0 }
 0x103   : > { %v586_v50 = vpop.f32.mrf.mxu3  ;;  %v673_v51 = vadd.f32 %v661_v6, %v596_v46 }
 0x104   : > { %v737_v49 = vpop.f32.mrf.mxu1  ;;  %v1081_v50 = vld [vmem:[%s1719_s7 + $0x30] sm:$0xff] }
 0x105   : > { %v1633_v53 = vadd.f32 %v737_v49, %v673_v51  ;;  %1116 = vperm.xlu0 %1348, %v1081_v50  }
 0x108   : > { %v793_v54 = vpop.f32.mrf.mxu2 }
 0x109   : > { %v817_v14 = vadd.f32 %v793_v54, %v1609_v52  ;;  %v1643_v52 = vld [vmem:[%s1714_s2] ss:$0 sm:$0xff] }
 0x10a   : > { %v663_v56 = vpop.f32.mrf.mxu0 }
 0x10b   : > { %v869_v55 = vpop.f32.mrf.mxu3 }
 0x10c   : > { %v739_v57 = vpop.f32.mrf.mxu1  ;;  %v893_v59 = vadd.f32 %v869_v55, %v817_v14 }
 0x110   : > { %v795_v58 = vpop.f32.mrf.mxu2 }
 0x111   : > { %v818_v2 = vadd.f32 %v795_v58, %v1614_v61 }
 0x112   : > { %v945_v63 = vpop.f32.mrf.mxu0 }
 0x113   : > { %v871_v62 = vpop.f32.mrf.mxu3  ;;  %v969_v3 = vadd.f32 %v945_v63, %v893_v59 }
 0x114   : > { %v894_v4 = vadd.f32 %v871_v62, %v818_v2  ;;  %v1079_v62 = vld [vmem:[%s1719_s7 + $0x20] sm:$0xff] }
 0x115   : > { %v982_v11 = vadd.f32 %v1643_v52, %v969_v3  ;;  %1106 = vperm.xlu2 %1350, %v1079_v62  }
 0x117   : > { %v991_v15 = vmax.f32 %v982_v11, 0.0 }
 0x118   : > { %v798_v5 = vpop.f32.mrf.mxu2 }
 0x119   : > { %v819_v18 = vadd.f32 %v798_v5, %v1617_v8  ;;  %v1078_v8 = vld [vmem:[%s1719_s7 + $0x18] sm:$0xff] }
 0x11a   : > { %v947_v10 = vpop.f32.mrf.mxu0  ;;  %1101 = vperm.xlu1 %1349, %v1078_v8  }
 0x11b   : > { %v874_v9 = vpop.f32.mrf.mxu3  ;;  %v970_v12 = vadd.f32 %v947_v10, %v894_v4 }
 0x11c   : > { %v895_v24 = vadd.f32 %v874_v9, %v819_v18 }
 0x11d   : > { %v983_v61 = vadd.f32 %v1643_v52, %v970_v12 }
 0x11f   : > { %v992_v16 = vmax.f32 %v983_v61, 0.0 }
 0x120   : > { %v800_v20 = vpop.f32.mrf.mxu2 }
 0x121   : > { %v1000_v7 = vpack.c.bf16 %v992_v16, %v991_v15  ;;  %v820_v26 = vadd.f32 %v800_v20, %v1620_v17  ;;  %v1083_v16 = vld [vmem:[%s1719_s7 + $0x40] sm:$0xff] }
 0x122   : > { %v950_v22 = vpop.f32.mrf.mxu0 }
 0x123   : > { %v876_v21 = vpop.f32.mrf.mxu3  ;;  %1327 = vmatmul.msk.bf16.vlgmr.msra.gmra.mxu1 %vm1017_vm3, %v1000_v7  ;;  %v971_v27 = vadd.f32 %v950_v22, %v895_v24 }
 0x124   : > { %v896_v28 = vadd.f32 %v876_v21, %v820_v26 }
 0x125   : > { %v984_v30 = vadd.f32 %v1643_v52, %v971_v27 }
 0x127   : > { %v993_v35 = vmax.f32 %v984_v30, 0.0 }
 0x128   : > { %v803_v29 = vpop.f32.mrf.mxu2 }
 0x129   : > { %v821_v37 = vadd.f32 %v803_v29, %v1622_v25  ;;  %v1082_v25 = vld [vmem:[%s1719_s7 + $0x38] sm:$0xff] }
 0x12a   : > { %v952_v19 = vpop.f32.mrf.mxu0  ;;  %1121 = vperm.xlu1 %1349, %v1082_v25  }
 0x12b   : > { %v879_v31 = vpop.f32.mrf.mxu3  ;;  %v972_v33 = vadd.f32 %v952_v19, %v896_v28  ;;  %v1352_v19 = vld [vmem:[%s1716_s4] ss:$0 sm:$0xff] }
 0x12c   : > { %v897_v60 = vadd.f32 %v879_v31, %v821_v37 }
 0x12d   : > { %v985_v34 = vadd.f32 %v1643_v52, %v972_v33 }
 0x12f   : > { %v994_v36 = vmax.f32 %v985_v34, 0.0 }
 0x130   : > { %v805_v17 = vpop.f32.mrf.mxu2 }
 0x131   : > { %v1001_v38 = vpack.c.bf16 %v994_v36, %v993_v35  ;;  %v822_v42 = vadd.f32 %v805_v17, %v1625_v32 }
 0x132   : > { %v955_v41 = vpop.f32.mrf.mxu0 }
 0x133   : > { %v881_v39 = vpop.f32.mrf.mxu3  ;;  %1328 = vmatmul.msk.bf16.gmra.mxu1 %vm1017_vm3, %v1001_v38  ;;  %v973_v43 = vadd.f32 %v955_v41, %v897_v60 }
 0x134   : > { %v898_v44 = vadd.f32 %v881_v39, %v822_v42 }
 0x135   : > { %v986_v6 = vadd.f32 %v1643_v52, %v973_v43 }
 0x137   : > { %v995_v49 = vmax.f32 %v986_v6, 0.0 }
 0x138   : > { %v808_v45 = vpop.f32.mrf.mxu2 }
 0x139   : > { %v823_v55 = vadd.f32 %v808_v45, %v1628_v40  ;;  %v1080_v40 = vld [vmem:[%s1719_s7 + $0x28] sm:$0xff] }
 0x13a   : > { %v957_v48 = vpop.f32.mrf.mxu0  ;;  %1111 = vperm.xlu2 %1350, %v1080_v40  }
 0x13b   : > { %v884_v46 = vpop.f32.mrf.mxu3  ;;  %v974_v51 = vadd.f32 %v957_v48, %v898_v44 }
 0x13c   : > { %v899_v63 = vadd.f32 %v884_v46, %v823_v55 }
 0x13d   : > { %v987_v32 = vadd.f32 %v1643_v52, %v974_v51 }
 0x13f   : > { %v996_v54 = vmax.f32 %v987_v32, 0.0 }
 0x140   : > { %v810_v56 = vpop.f32.mrf.mxu2 }
 0x141   : > { %v1002_v57 = vpack.c.bf16 %v996_v54, %v995_v49  ;;  %v824_v0 = vadd.f32 %v810_v56, %v1631_v47 }
 0x142   : > { %v960_v58 = vpop.f32.mrf.mxu0  ;;  %1126 = vperm.xlu2 %1350, %v1083_v16  }
 0x143   : > { %v886_v14 = vpop.f32.mrf.mxu3  ;;  %1329 = vmatmul.msk.bf16.gmra.mxu1 %vm1017_vm3, %v1002_v57  ;;  %v975_v1 = vadd.f32 %v960_v58, %v899_v63 }
 0x144   : > { %v900_v59 = vadd.f32 %v886_v14, %v824_v0 }
 0x145   : > { %v988_v5 = vadd.f32 %v1643_v52, %v975_v1 }
 0x147   : > { %v997_v12 = vmax.f32 %v988_v5, 0.0 }
 0x148   : > { %v813_v2 = vpop.f32.mrf.mxu2 }
 0x149   : > { %v825_v10 = vadd.f32 %v813_v2, %v1633_v53  ;;  %v1087_v31 = vpop.permute.xlu0 %1086 }
 0x14a   : > { %v962_v4 = vpop.f32.mrf.mxu0 }
 0x14b   : > { %v889_v3 = vpop.f32.mrf.mxu3  ;;  %v976_v9 = vadd.f32 %v962_v4, %v900_v59 }
 0x14c   : > { %v901_v47 = vadd.f32 %v889_v3, %v825_v10 }
 0x14d   : > { %v989_v11 = vadd.f32 %v1643_v52, %v976_v9 }
 0x14f   : > { %v998_v13 = vmax.f32 %v989_v11, 0.0 }
 0x150   : > { %v815_v15 = vpop.f32.mrf.mxu2 }
 0x151   : > { %v1003_v61 = vpack.c.bf16 %v998_v13, %v997_v12  ;;  %v1092_v38 = vpop.permute.xlu0 %1091 }
 0x152   : > { %v965_v18 = vpop.f32.mrf.mxu0 }
 0x153   : > { %v891_v7 = vpop.f32.mrf.mxu3  ;;  %v977_v20 = vadd.f32 %v965_v18, %v901_v47  ;;  %1330 = vmatmul.msk.bf16.gmra.mxu1 %vm1017_vm3, %v1003_v61 }
 0x155   : > { %v990_v21 = vadd.f32 %v1643_v52, %v977_v20 }
 0x157   : > { %v999_v22 = vmax.f32 %v990_v21, 0.0 }
 0x158   : > { %v1097_v30 = vpop.permute.xlu1 %1096 }
 0x159   : > { %v1004_v23 = vpack.c.bf16 %v999_v22, %v999_v22 }
 0x15a   : > { %v967_v53 = vpop.f32.mrf.mxu0 }
 0x163   : > { %1331 = vmatmul.msk.bf16.gmra.mxu1 %vm1017_vm3, %v1004_v23 }
 0x16f   : > { %v1107_v35 = vpop.permute.xlu2 %1106 }
 0x177   : > { %v1117_v2 = vpop.permute.xlu0 %1116 }
 0x18c   : > { %v1102_v46 = vpop.permute.xlu1 %1101 }
 0x194   : > { %v1112_v54 = vpop.permute.xlu2 %1111 }
 0x19c   : > { %v1122_v5 = vpop.permute.xlu1 %1121  ;;  %v1127_v7 = vpop.permute.xlu2 %1126 }
 0x1a0   : > { %v1042_v24 = vpop.f32.mrf.mxu1 }
 0x1a1   : > { %v1043_v34 = vadd.f32 %v1352_v19, %v1042_v24 }
 0x1a3   : > { %v1066_v17 = vmax.f32 %v1043_v34, 0.0 }
 0x1a5   : > { %v1129_v45 = vmul.f32 %v1087_v31, %v1066_v17  ;;  %v1162_v31 = vld [vmem:[%s1717_s5] sm:$0x1] }
 0x1a7   : > { %v1139_v49 = vsel %vm1138_vm4, %v1129_v45, 0.0 }
 0x1a8   : > { %v1044_v26 = vpop.f32.mrf.mxu1 }
 0x1a9   : > { %v1045_v33 = vadd.f32 %v1352_v19, %v1044_v26 }
 0x1ab   : > { %v1067_v36 = vmax.f32 %v1045_v33, 0.0  ;;  %v1168_v33 = vld [vmem:[#allocation2] sm:$0x1] }
 0x1ad   : > { %v1130_v42 = vmul.f32 %v1092_v38, %v1067_v36 }
 0x1af   : > { %v1140_v6 = vsel %vm1138_vm4, %v1130_v42, 0.0 }
 0x1b0   : > { %v1047_v27 = vpop.f32.mrf.mxu1  ;;  %v1141_v62 = vadd.f32 %v1140_v6, %v1139_v49 }
 0x1b1   : > { %v1048_v52 = vadd.f32 %v1352_v19, %v1047_v27 }
 0x1b3   : > { %v1068_v41 = vmax.f32 %v1048_v52, 0.0 }
 0x1b5   : > { %v1131_v48 = vmul.f32 %v1097_v30, %v1068_v41 }
 0x1b7   : > { %v1142_v56 = vsel %vm1138_vm4, %v1131_v48, 0.0 }
 0x1b8   : > { %v1049_v28 = vpop.f32.mrf.mxu1  ;;  %v1143_v59 = vadd.f32 %v1142_v56, %v1141_v62 }
 0x1b9   : > { %v1050_v37 = vadd.f32 %v1352_v19, %v1049_v28 }
 0x1bb   : > { %v1069_v43 = vmax.f32 %v1050_v37, 0.0 }
 0x1bd   : > { %v1132_v51 = vmul.f32 %v1102_v46, %v1069_v43 }
 0x1bf   : > { %v1144_v63 = vsel %vm1138_vm4, %v1132_v51, 0.0 }
 0x1c0   : > { %v1052_v29 = vpop.f32.mrf.mxu1  ;;  %v1145_v4 = vadd.f32 %v1144_v63, %v1143_v59 }
 0x1c1   : > { %v1053_v60 = vadd.f32 %v1352_v19, %v1052_v29 }
 0x1c3   : > { %v1070_v50 = vmax.f32 %v1053_v60, 0.0 }
 0x1c5   : > { %v1133_v57 = vmul.f32 %v1107_v35, %v1070_v50 }
 0x1c7   : > { %v1146_v40 = vsel %vm1138_vm4, %v1133_v57, 0.0 }
 0x1c8   : > { %v1054_v8 = vpop.f32.mrf.mxu1  ;;  %v1147_v11 = vadd.f32 %v1146_v40, %v1145_v4 }
 0x1c9   : > { %v1055_v44 = vadd.f32 %v1352_v19, %v1054_v8 }
 0x1cb   : > { %v1071_v32 = vmax.f32 %v1055_v44, 0.0 }
 0x1cd   : > { %v1134_v0 = vmul.f32 %v1112_v54, %v1071_v32 }
 0x1cf   : > { %v1148_v9 = vsel %vm1138_vm4, %v1134_v0, 0.0 }
 0x1d0   : > { %v1057_v39 = vpop.f32.mrf.mxu1  ;;  %v1149_v61 = vadd.f32 %v1148_v9, %v1147_v11 }
 0x1d1   : > { %v1058_v25 = vadd.f32 %v1352_v19, %v1057_v39 }
 0x1d3   : > { %v1072_v14 = vmax.f32 %v1058_v25, 0.0 }
 0x1d5   : > { %v1135_v3 = vmul.f32 %v1117_v2, %v1072_v14 }
 0x1d7   : > { %v1150_v13 = vsel %vm1138_vm4, %v1135_v3, 0.0 }
 0x1d8   : > { %v1059_v55 = vpop.f32.mrf.mxu1  ;;  %v1151_v18 = vadd.f32 %v1150_v13, %v1149_v61 }
 0x1d9   : > { %v1060_v58 = vadd.f32 %v1352_v19, %v1059_v55 }
 0x1db   : > { %v1073_v1 = vmax.f32 %v1060_v58, 0.0 }
 0x1dd   : > { %v1136_v10 = vmul.f32 %v1122_v5, %v1073_v1 }
 0x1df   : > { %v1152_v15 = vsel %vm1138_vm4, %v1136_v10, 0.0 }
 0x1e0   : > { %v1062_v12 = vpop.f32.mrf.mxu1  ;;  %v1153_v21 = vadd.f32 %v1152_v15, %v1151_v18 }
 0x1e1   : > { %v1063_v47 = vadd.f32 %v1352_v19, %v1062_v12 }
 0x1e3   : > { %v1074_v16 = vmax.f32 %v1063_v47, 0.0 }
 0x1e5   : > { %v1137_v20 = vmul.f32 %v1127_v7, %v1074_v16 }
 0x1e7   : > { %v1154_v53 = vsel %vm1138_vm4, %v1137_v20, 0.0 }
 0x1e8   : > { %v1155_v22 = vadd.f32 %v1154_v53, %v1153_v21  ;;  %v1064_v23 = vpop.f32.mrf.mxu1 }
 0x1ea   : > { %v1156_v24 = vrot.slane %v1155_v22, 4 }
 0x1ec   : > { %v1157_v26 = vadd.f32 %v1156_v24, %v1155_v22 }
 0x1ee   : > { %v1158_v27 = vrot.slane %v1157_v26, 2 }
 0x1f0   : > { %v1159_v28 = vadd.f32 %v1158_v27, %v1157_v26 }
 0x1f2   : > { %v1160_v29 = vrot.slane %v1159_v28, 1 }
 0x1f4   : > { %v1161_v19 = vadd.f32 %v1160_v29, %v1159_v28 }
 0x1f6   : > { %v1163_v8 = vmul.f32 %v1162_v31, %v1161_v19 }
 0x1f8   : > { %v1165_v30 = vsel %vm1164_vm5, %v1163_v8, 0.0 }
 0x1f9   : > { %1166 = vadd.xlane.f32.xlu0 %v1165_v30 }
 0x26c   : > { %v1167_v34 = vpop.xlane.xlu0 %1166 }
 0x26d   : > { %v1169_v52 = vadd.f32 %v1168_v33, %v1167_v34 }
 0x26f   : > { %1171 = vst.msk [vmem:[%s303_s16] sm:$0x1] %vm1170_vm6, %v1169_v52 }
 0x270 PF: > { %s20_s29 = sadd.s32 1, %s1359_s29  }
 0x271   : > { %p17_p4 = scmp.ge.s32.totalorder %s20_s29, 4  }
 0x273   :  { %19 = sbr.rel (!%p17_p4) target bundleno = 3 (0x3), region = 93 }

</bundles_post_ra>
